<compile_context>
chip_gen: v7x
topology: tpu7x:2x2x1
jax: 0.10.0
libtpu: 0.0.40
codegen_flags: <defaults>
</compile_context>

<pallas_src>
import jax
import jax.numpy as jnp
from jax.experimental import pallas as pl
from jax.experimental.pallas import tpu as pltpu

_LANES = 128
_ROW_ALIGN = 32          # covers f32(8)/bf16(16)/int8-bool(32) sublane tiling
_MAX_TILE_ROWS = 8192    # 4 MiB f32 per input per buffer; 16 MiB double-buffered


def _round_up(x, m):
    return ((x + m - 1) // m) * m


def _make_kernel(with_logits: bool, tile_rows: int, rows_valid: int,
                 lane_rem: int, needs_mask: bool):
    def kernel(pred_ref, label_ref, loss_ref,
               cnt_acc, s1_acc, s2_acc, thre_ref, bce_acc, sel_acc):
        pass_idx = pl.program_id(0)   # 0 = stats pass, 1 = BCE pass
        tile_idx = pl.program_id(1)
        n_tiles = pl.num_programs(1)

        def fold(x):
            # (tile_rows, 128) -> (8, 128) partial sums; VPU adds only, the
            # cross-lane reduction is deferred to the finalize blocks.
            return jnp.sum(x.reshape(tile_rows // 8, 8, _LANES), axis=0)

        x = pred_ref[...].astype(jnp.float32)     # raw input (logits or probs)
        lab = label_ref[...]

        if needs_mask:
            # Valid-element mask for over-run rows / partial last row.
            # Row/col comparisons (no flat int32 index -> no overflow).
            row = jax.lax.broadcasted_iota(jnp.int32, (tile_rows, _LANES), 0)
            col = jax.lax.broadcasted_iota(jnp.int32, (tile_rows, _LANES), 1)
            g_row = tile_idx * tile_rows + row
            valid = jnp.logical_or(
                g_row < rows_valid - 1,
                jnp.logical_and(g_row == rows_valid - 1, col < lane_rem))
        else:
            valid = None

        @pl.when(pass_idx == 0)
        def _stats_pass():
            @pl.when(tile_idx == 0)
            def _init():
                cnt_acc[...] = jnp.zeros_like(cnt_acc)
                s1_acc[...] = jnp.zeros_like(s1_acc)
                s2_acc[...] = jnp.zeros_like(s2_acc)

            p = x if with_logits else jax.nn.sigmoid(x)
            pos = lab > 0
            if needs_mask:
                pos = jnp.logical_and(pos, valid)
            # select (not multiply) so OOB NaN/Inf cannot reach the accumulators
            pc = jnp.where(pos, p - 0.5, 0.0)      # centered for f32 stability
            cnt_acc[...] += fold(pos.astype(jnp.float32))
            s1_acc[...] += fold(pc)
            s2_acc[...] += fold(pc * pc)

            @pl.when(tile_idx == n_tiles - 1)
            def _finalize_stats():
                # NOTE: n==0 -> NaN, n==1 -> NaN/inf threshold; mirrors the
                # torch reference's edge behavior for no/one positive label.
                n = jnp.sum(cnt_acc[...], keepdims=True)       # (1,1)
                s1 = jnp.sum(s1_acc[...], keepdims=True)
                s2 = jnp.sum(s2_acc[...], keepdims=True)
                mean = 0.5 + s1 / n
                var = (s2 - s1 * s1 / n) / (n - 1.0)   # torch.var is unbiased
                thre_ref[...] = mean + var

        @pl.when(pass_idx == 1)
        def _bce_pass():
            @pl.when(tile_idx == 0)
            def _init():
                bce_acc[...] = jnp.zeros_like(bce_acc)
                sel_acc[...] = jnp.zeros_like(sel_acc)

            y = lab.astype(jnp.float32)
            t = thre_ref[...]                       # (1,1), probability space
            if with_logits:
                # pred is already a probability: probability-space path.
                sel = jnp.logical_or(x > t, x < 1.0 - t)
                logp = jnp.maximum(jnp.log(x), -100.0)
                log1mp = jnp.maximum(jnp.log(1.0 - x), -100.0)
                bce = -(y * logp + (1.0 - y) * log1mp)
            else:
                # Logit-space selection + with-logits BCE: no per-element
                # sigmoid / raw logs in the hot pass (EUP relief).
                # logit(thre); logit(1 - thre) == -logit(thre).  Degenerate
                # thresholds (thre >= 1) give inf/NaN -> all comparisons False,
                # matching the probability-space reference.
                hi = jnp.log(t) - jnp.log1p(-t)                       # (1,1)
                sel = jnp.logical_or(x > hi, x < -hi)
                sp = jnp.maximum(x, 0.0) + jnp.log1p(jnp.exp(-jnp.abs(x)))  # softplus(x)
                spn = sp - x                                           # softplus(-x)
                # min(., 100) matches F.binary_cross_entropy's log clamp at -100
                bce = y * jnp.minimum(spn, 100.0) + (1.0 - y) * jnp.minimum(sp, 100.0)
            if needs_mask:
                sel = jnp.logical_and(sel, valid)
            bce_acc[...] += fold(jnp.where(sel, bce, 0.0))
            sel_acc[...] += fold(sel.astype(jnp.float32))

            @pl.when(tile_idx == n_tiles - 1)
            def _finalize_loss():
                loss_ref[...] = (jnp.sum(bce_acc[...], keepdims=True) /
                                 jnp.sum(sel_acc[...], keepdims=True))

    return kernel


def assbce_loss_pallas(pred, label, with_logits: bool = False):
    total = int(pred.size)
    pred_flat = jnp.ravel(pred)                 # native dtype, no upcast
    label_flat = jnp.ravel(label)
    if label_flat.dtype == jnp.bool_:
        label_flat = label_flat.astype(jnp.int8)   # 1 B/elem label stream
    # NOTE: float labels are kept in their native dtype (soft labels allowed).

    rows = pl.cdiv(total, _LANES)               # number of 128-lane rows
    lane_pad = rows * _LANES - total
    if lane_pad:
        # Only case that costs an extra copy; 128-multiple sizes reshape free.
        pred_flat = jnp.pad(pred_flat, (0, lane_pad))
        label_flat = jnp.pad(label_flat, (0, lane_pad))
    pred2 = pred_flat.reshape(rows, _LANES)
    label2 = label_flat.reshape(rows, _LANES)

    tile_rows = min(_MAX_TILE_ROWS, _round_up(rows, _ROW_ALIGN))
    n_tiles = pl.cdiv(rows, tile_rows)          # last tile may over-run `rows`
    lane_rem = total - (rows - 1) * _LANES      # valid lanes in last row
    needs_mask = (rows % tile_rows != 0) or (lane_pad != 0)

    tile_spec = pl.BlockSpec((tile_rows, _LANES), lambda p, t: (t, 0))
    out = pl.pallas_call(
        _make_kernel(with_logits, tile_rows, rows, lane_rem, needs_mask),
        out_shape=jax.ShapeDtypeStruct((1, 1), jnp.float32),
        grid_spec=pltpu.PrefetchScalarGridSpec(
            num_scalar_prefetch=0,
            grid=(2, n_tiles),                  # pass axis first (stats before BCE)
            in_specs=[tile_spec, tile_spec],
            out_specs=pl.BlockSpec((1, 1), lambda p, t: (0, 0)),
            scratch_shapes=[
                pltpu.VMEM((8, _LANES), jnp.float32),   # count(label>0) partials
                pltpu.VMEM((8, _LANES), jnp.float32),   # sum(p-0.5) partials
                pltpu.VMEM((8, _LANES), jnp.float32),   # sum((p-0.5)^2) partials
                pltpu.VMEM((1, 1), jnp.float32),        # threshold (prob space)
                pltpu.VMEM((8, _LANES), jnp.float32),   # selected BCE partials
                pltpu.VMEM((8, _LANES), jnp.float32),   # selected count partials
            ],
        ),
        compiler_params=pltpu.CompilerParams(
            dimension_semantics=("arbitrary", "arbitrary"),
            vmem_limit_bytes=32 << 20),
    )(pred2, label2)
    return out[0, 0]


if __name__ == "__main__":
    key = jax.random.PRNGKey(0)
    k1, k2, k3, k4 = jax.random.split(key, 4)

    # Test 1: raw logits, with_logits=False (module default); 2048 elements,
    # 128-aligned (no wrapper pad), single resident tile, over-run mask path.
    x = jax.random.normal(k1, (2, 4, 16, 16), dtype=jnp.float32)
    label = (jax.random.uniform(k2, (2, 4, 16, 16)) > 0.5).astype(jnp.float32)
    loss = jax.block_until_ready(assbce_loss_pallas(x, label, with_logits=False))

    pred = jax.nn.sigmoid(x)
    tmp = pred[label > 0]
    thre = tmp.mean() + tmp.var(ddof=1)
    sel = jnp.logical_or(pred > thre, pred < 1.0 - thre)
    p_s, l_s = pred[sel], label[sel]
    ref = jnp.mean(-(l_s * jnp.log(p_s) + (1.0 - l_s) * jnp.log(1.0 - p_s)))
    assert jnp.allclose(loss, ref, rtol=1e-3, atol=1e-4), (float(loss), float(ref))

    # Test 2: probabilities, with_logits=True; odd size exercises the
    # lane-pad + in-kernel mask path.
    p2 = jax.random.uniform(k3, (3, 5, 7), dtype=jnp.float32,
                            minval=0.01, maxval=0.99)
    lab2 = (jax.random.uniform(k4, (3, 5, 7)) > 0.5).astype(jnp.float32)
    loss2 = jax.block_until_ready(assbce_loss_pallas(p2, lab2, with_logits=True))

    tmp2 = p2[lab2 > 0]
    thre2 = tmp2.mean() + tmp2.var(ddof=1)
    sel2 = jnp.logical_or(p2 > thre2, p2 < 1.0 - thre2)
    ps2, ls2 = p2[sel2], lab2[sel2]
    ref2 = jnp.mean(-(ls2 * jnp.log(ps2) + (1.0 - ls2) * jnp.log(1.0 - ps2)))
    assert jnp.allclose(loss2, ref2, rtol=1e-3, atol=1e-4), (float(loss2), float(ref2))

    print("KERNEL_OK")
</pallas_src>

<mosaic_0001>
module attributes {stable_mosaic.version = 11 : i64} {
  func.func @kernel(%arg0: i32, %arg1: i32, %arg2: memref<32x128xf32, #tpu.memory_space<vmem>>, %arg3: memref<32x128xf32, #tpu.memory_space<vmem>>, %arg4: memref<1x1xf32, #tpu.memory_space<vmem>>, %arg5: memref<8x128xf32, #tpu.memory_space<vmem>>, %arg6: memref<8x128xf32, #tpu.memory_space<vmem>>, %arg7: memref<8x128xf32, #tpu.memory_space<vmem>>, %arg8: memref<1x1xf32, #tpu.memory_space<vmem>>, %arg9: memref<8x128xf32, #tpu.memory_space<vmem>>, %arg10: memref<8x128xf32, #tpu.memory_space<vmem>>) attributes {dimension_semantics = [#tpu.dimension_semantics<arbitrary>, #tpu.dimension_semantics<arbitrary>], iteration_bounds = array<i64: 2, 1>, scalar_prefetch = 0 : i64, scratch_operands = 6 : i64, tpu.core_type = #tpu.core_type<tc>, window_params = [{transform_indices = @transform_0, window_bounds = array<i64: 32, 128>}, {transform_indices = @transform_1, window_bounds = array<i64: 32, 128>}, {pipeline_mode = #tpu.pipeline_mode<synchronous>, transform_indices = @transform_2, window_bounds = array<i64: 1, 1>}]} {
    %c0 = arith.constant 0 : index
    %c0_0 = arith.constant 0 : index
    %0 = vector.load %arg2[%c0, %c0_0] : memref<32x128xf32, #tpu.memory_space<vmem>>, vector<32x128xf32>
    %c0_1 = arith.constant 0 : index
    %c0_2 = arith.constant 0 : index
    %1 = vector.load %arg3[%c0_1, %c0_2] : memref<32x128xf32, #tpu.memory_space<vmem>>, vector<32x128xf32>
    %2 = tpu.iota {dimensions = array<i32: 0>} : vector<32x128xi32>
    %3 = tpu.iota {dimensions = array<i32: 1>} : vector<32x128xi32>
    %c32_i32 = arith.constant 32 : i32
    %4 = arith.muli %arg1, %c32_i32 : i32
    %5 = vector.broadcast %4 : i32 to vector<32x128xi32>
    %6 = arith.addi %5, %2 : vector<32x128xi32>
    %c15_i32 = arith.constant 15 : i32
    %7 = vector.broadcast %c15_i32 : i32 to vector<32x128xi32>
    %8 = arith.cmpi slt, %6, %7 : vector<32x128xi32>
    %c15_i32_3 = arith.constant 15 : i32
    %9 = vector.broadcast %c15_i32_3 : i32 to vector<32x128xi32>
    %10 = arith.cmpi eq, %6, %9 : vector<32x128xi32>
    %c128_i32 = arith.constant 128 : i32
    %11 = vector.broadcast %c128_i32 : i32 to vector<32x128xi32>
    %12 = arith.cmpi slt, %3, %11 : vector<32x128xi32>
    %13 = arith.andi %10, %12 : vector<32x128xi1>
    %14 = arith.ori %8, %13 : vector<32x128xi1>
    %c0_i32 = arith.constant 0 : i32
    %15 = arith.cmpi eq, %arg0, %c0_i32 : i32
    %16 = arith.extui %15 : i1 to i32
    %c0_i32_4 = arith.constant 0 : i32
    %17 = arith.cmpi ne, %16, %c0_i32_4 : i32
    scf.if %17 {
      %c0_i32_6 = arith.constant 0 : i32
      %21 = arith.cmpi eq, %arg1, %c0_i32_6 : i32
      %22 = arith.extui %21 : i1 to i32
      %c0_i32_7 = arith.constant 0 : i32
      %23 = arith.cmpi ne, %22, %c0_i32_7 : i32
      scf.if %23 {
        %cst_28 = arith.constant 0.000000e+00 : f32
        %57 = vector.broadcast %cst_28 : f32 to vector<8x128xf32>
        %c0_29 = arith.constant 0 : index
        %c0_30 = arith.constant 0 : index
        %58 = vector.load %arg5[%c0_29, %c0_30] : memref<8x128xf32, #tpu.memory_space<vmem>>, vector<8x128xf32>
        tpu.vector_store %arg5[%c0_29, %c0_30], %57 {strides = array<i32>} : memref<8x128xf32, #tpu.memory_space<vmem>>, vector<8x128xf32>,
        %cst_31 = arith.constant 0.000000e+00 : f32
        %59 = vector.broadcast %cst_31 : f32 to vector<8x128xf32>
        %c0_32 = arith.constant 0 : index
        %c0_33 = arith.constant 0 : index
        %60 = vector.load %arg6[%c0_32, %c0_33] : memref<8x128xf32, #tpu.memory_space<vmem>>, vector<8x128xf32>
        tpu.vector_store %arg6[%c0_32, %c0_33], %59 {strides = array<i32>} : memref<8x128xf32, #tpu.memory_space<vmem>>, vector<8x128xf32>,
        %cst_34 = arith.constant 0.000000e+00 : f32
        %61 = vector.broadcast %cst_34 : f32 to vector<8x128xf32>
        %c0_35 = arith.constant 0 : index
        %c0_36 = arith.constant 0 : index
        %62 = vector.load %arg7[%c0_35, %c0_36] : memref<8x128xf32, #tpu.memory_space<vmem>>, vector<8x128xf32>
        tpu.vector_store %arg7[%c0_35, %c0_36], %61 {strides = array<i32>} : memref<8x128xf32, #tpu.memory_space<vmem>>, vector<8x128xf32>,
      } else {
      }
      %24 = arith.negf %0 : vector<32x128xf32>
      %25 = math.exp %24 : vector<32x128xf32>
      %cst = arith.constant 1.000000e+00 : f32
      %26 = vector.broadcast %cst : f32 to vector<32x128xf32>
      %27 = arith.addf %26, %25 : vector<32x128xf32>
      %28 = arith.divf %26, %27 : vector<32x128xf32>
      %cst_8 = arith.constant 0.000000e+00 : f32
      %29 = vector.broadcast %cst_8 : f32 to vector<32x128xf32>
      %30 = arith.cmpf ogt, %1, %29 : vector<32x128xf32>
      %31 = arith.andi %30, %14 : vector<32x128xi1>
      %cst_9 = arith.constant 5.000000e-01 : f32
      %32 = vector.broadcast %cst_9 : f32 to vector<32x128xf32>
      %33 = arith.subf %28, %32 : vector<32x128xf32>
      %cst_10 = arith.constant 0.000000e+00 : f32
      %34 = vector.broadcast %cst_10 : f32 to vector<32x128xf32>
      %35 = arith.select %31, %33, %34 : vector<32x128xi1>, vector<32x128xf32>
      %c0_11 = arith.constant 0 : index
      %c0_12 = arith.constant 0 : index
      %36 = vector.load %arg5[%c0_11, %c0_12] : memref<8x128xf32, #tpu.memory_space<vmem>>, vector<8x128xf32>
      %37 = arith.extui %31 : vector<32x128xi1> to vector<32x128xi32>
      %38 = arith.sitofp %37 : vector<32x128xi32> to vector<32x128xf32>
      %39 = vector.shape_cast %38 : vector<32x128xf32> to vector<4x8x128xf32>
      %cst_13 = arith.constant dense<0.000000e+00> : vector<8x128xf32>
      %40 = vector.multi_reduction <add>, %39, %cst_13 [0] : vector<4x8x128xf32> to vector<8x128xf32>
      %41 = arith.addf %36, %40 : vector<8x128xf32>
      %c0_14 = arith.constant 0 : index
      %c0_15 = arith.constant 0 : index
      %42 = vector.load %arg5[%c0_14, %c0_15] : memref<8x128xf32, #tpu.memory_space<vmem>>, vector<8x128xf32>
      tpu.vector_store %arg5[%c0_14, %c0_15], %41 {strides = array<i32>} : memref<8x128xf32, #tpu.memory_space<vmem>>, vector<8x128xf32>,
      %c0_16 = arith.constant 0 : index
      %c0_17 = arith.constant 0 : index
      %43 = vector.load %arg6[%c0_16, %c0_17] : memref<8x128xf32, #tpu.memory_space<vmem>>, vector<8x128xf32>
      %44 = vector.shape_cast %35 : vector<32x128xf32> to vector<4x8x128xf32>
      %cst_18 = arith.constant dense<0.000000e+00> : vector<8x128xf32>
      %45 = vector.multi_reduction <add>, %44, %cst_18 [0] : vector<4x8x128xf32> to vector<8x128xf32>
      %46 = arith.addf %43, %45 : vector<8x128xf32>
      %c0_19 = arith.constant 0 : index
      %c0_20 = arith.constant 0 : index
      %47 = vector.load %arg6[%c0_19, %c0_20] : memref<8x128xf32, #tpu.memory_space<vmem>>, vector<8x128xf32>
      tpu.vector_store %arg6[%c0_19, %c0_20], %46 {strides = array<i32>} : memref<8x128xf32, #tpu.memory_space<vmem>>, vector<8x128xf32>,
      %c0_21 = arith.constant 0 : index
      %c0_22 = arith.constant 0 : index
      %48 = vector.load %arg7[%c0_21, %c0_22] : memref<8x128xf32, #tpu.memory_space<vmem>>, vector<8x128xf32>
      %49 = arith.mulf %35, %35 : vector<32x128xf32>
      %50 = vector.shape_cast %49 : vector<32x128xf32> to vector<4x8x128xf32>
      %cst_23 = arith.constant dense<0.000000e+00> : vector<8x128xf32>
      %51 = vector.multi_reduction <add>, %50, %cst_23 [0] : vector<4x8x128xf32> to vector<8x128xf32>
      %52 = arith.addf %48, %51 : vector<8x128xf32>
      %c0_24 = arith.constant 0 : index
      %c0_25 = arith.constant 0 : index
      %53 = vector.load %arg7[%c0_24, %c0_25] : memref<8x128xf32, #tpu.memory_space<vmem>>, vector<8x128xf32>
      tpu.vector_store %arg7[%c0_24, %c0_25], %52 {strides = array<i32>} : memref<8x128xf32, #tpu.memory_space<vmem>>, vector<8x128xf32>,
      %c0_i32_26 = arith.constant 0 : i32
      %54 = arith.cmpi eq, %arg1, %c0_i32_26 : i32
      %55 = arith.extui %54 : i1 to i32
      %c0_i32_27 = arith.constant 0 : i32
      %56 = arith.cmpi ne, %55, %c0_i32_27 : i32
      scf.if %56 {
        %c0_28 = arith.constant 0 : index
        %c0_29 = arith.constant 0 : index
        %57 = vector.load %arg5[%c0_28, %c0_29] : memref<8x128xf32, #tpu.memory_space<vmem>>, vector<8x128xf32>
        %58 = vector.shape_cast %57 : vector<8x128xf32> to vector<1x8x128xf32>
        %cst_30 = arith.constant dense<0.000000e+00> : vector<1xf32>
        %59 = vector.multi_reduction <add>, %58, %cst_30 [1, 2] : vector<1x8x128xf32> to vector<1xf32>
        %60 = vector.shape_cast %59 : vector<1xf32> to vector<1x1x1xf32>
        %61 = vector.extract %60[0, 0, 0] : f32 from vector<1x1x1xf32>
        %62 = vector.broadcast %61 : f32 to vector<1x1xf32>
        %c0_31 = arith.constant 0 : index
        %c0_32 = arith.constant 0 : index
        %63 = vector.load %arg6[%c0_31, %c0_32] : memref<8x128xf32, #tpu.memory_space<vmem>>, vector<8x128xf32>
        %64 = vector.shape_cast %63 : vector<8x128xf32> to vector<1x8x128xf32>
        %cst_33 = arith.constant dense<0.000000e+00> : vector<1xf32>
        %65 = vector.multi_reduction <add>, %64, %cst_33 [1, 2] : vector<1x8x128xf32> to vector<1xf32>
        %66 = vector.shape_cast %65 : vector<1xf32> to vector<1x1x1xf32>
        %67 = vector.extract %66[0, 0, 0] : f32 from vector<1x1x1xf32>
        %68 = vector.broadcast %67 : f32 to vector<1x1xf32>
        %c0_34 = arith.constant 0 : index
        %c0_35 = arith.constant 0 : index
        %69 = vector.load %arg7[%c0_34, %c0_35] : memref<8x128xf32, #tpu.memory_space<vmem>>, vector<8x128xf32>
        %70 = vector.shape_cast %69 : vector<8x128xf32> to vector<1x8x128xf32>
        %cst_36 = arith.constant dense<0.000000e+00> : vector<1xf32>
        %71 = vector.multi_reduction <add>, %70, %cst_36 [1, 2] : vector<1x8x128xf32> to vector<1xf32>
        %72 = vector.shape_cast %71 : vector<1xf32> to vector<1x1x1xf32>
        %73 = vector.extract %72[0, 0, 0] : f32 from vector<1x1x1xf32>
        %74 = vector.broadcast %73 : f32 to vector<1x1xf32>
        %75 = arith.divf %68, %62 : vector<1x1xf32>
        %cst_37 = arith.constant 5.000000e-01 : f32
        %76 = vector.broadcast %cst_37 : f32 to vector<1x1xf32>
        %77 = arith.addf %76, %75 : vector<1x1xf32>
        %78 = arith.mulf %68, %68 : vector<1x1xf32>
        %79 = arith.divf %78, %62 : vector<1x1xf32>
        %80 = arith.subf %74, %79 : vector<1x1xf32>
        %cst_38 = arith.constant 1.000000e+00 : f32
        %81 = vector.broadcast %cst_38 : f32 to vector<1x1xf32>
        %82 = arith.subf %62, %81 : vector<1x1xf32>
        %83 = arith.divf %80, %82 : vector<1x1xf32>
        %84 = arith.addf %77, %83 : vector<1x1xf32>
        %c0_39 = arith.constant 0 : index
        %c0_40 = arith.constant 0 : index
        %85 = vector.load %arg8[%c0_39, %c0_40] : memref<1x1xf32, #tpu.memory_space<vmem>>, vector<1x1xf32>
        tpu.vector_store %arg8[%c0_39, %c0_40], %84 {strides = array<i32>} : memref<1x1xf32, #tpu.memory_space<vmem>>, vector<1x1xf32>,
      } else {
      }
    } else {
    }
    %c1_i32 = arith.constant 1 : i32
    %18 = arith.cmpi eq, %arg0, %c1_i32 : i32
    %19 = arith.extui %18 : i1 to i32
    %c0_i32_5 = arith.constant 0 : i32
    %20 = arith.cmpi ne, %19, %c0_i32_5 : i32
    scf.if %20 {
      %c0_i32_6 = arith.constant 0 : i32
      %21 = arith.cmpi eq, %arg1, %c0_i32_6 : i32
      %22 = arith.extui %21 : i1 to i32
      %c0_i32_7 = arith.constant 0 : i32
      %23 = arith.cmpi ne, %22, %c0_i32_7 : i32
      scf.if %23 {
        %cst_29 = arith.constant 0.000000e+00 : f32
        %73 = vector.broadcast %cst_29 : f32 to vector<8x128xf32>
        %c0_30 = arith.constant 0 : index
        %c0_31 = arith.constant 0 : index
        %74 = vector.load %arg9[%c0_30, %c0_31] : memref<8x128xf32, #tpu.memory_space<vmem>>, vector<8x128xf32>
        tpu.vector_store %arg9[%c0_30, %c0_31], %73 {strides = array<i32>} : memref<8x128xf32, #tpu.memory_space<vmem>>, vector<8x128xf32>,
        %cst_32 = arith.constant 0.000000e+00 : f32
        %75 = vector.broadcast %cst_32 : f32 to vector<8x128xf32>
        %c0_33 = arith.constant 0 : index
        %c0_34 = arith.constant 0 : index
        %76 = vector.load %arg10[%c0_33, %c0_34] : memref<8x128xf32, #tpu.memory_space<vmem>>, vector<8x128xf32>
        tpu.vector_store %arg10[%c0_33, %c0_34], %75 {strides = array<i32>} : memref<8x128xf32, #tpu.memory_space<vmem>>, vector<8x128xf32>,
      } else {
      }
      %c0_8 = arith.constant 0 : index
      %c0_9 = arith.constant 0 : index
      %24 = vector.load %arg8[%c0_8, %c0_9] : memref<1x1xf32, #tpu.memory_space<vmem>>, vector<1x1xf32>
      %25 = math.log %24 : vector<1x1xf32>
      %cst = arith.constant 0.000000e+00 : f32
      %26 = vector.broadcast %cst : f32 to vector<1x1xf32>
      %27 = arith.subf %26, %24 : vector<1x1xf32>
      %28 = math.log1p %27 : vector<1x1xf32>
      %29 = arith.subf %25, %28 : vector<1x1xf32>
      %30 = vector.broadcast %29 : vector<1x1xf32> to vector<32x128xf32>
      %31 = arith.cmpf ogt, %0, %30 : vector<32x128xf32>
      %cst_10 = arith.constant 0.000000e+00 : f32
      %32 = vector.broadcast %cst_10 : f32 to vector<1x1xf32>
      %33 = arith.subf %32, %29 : vector<1x1xf32>
      %34 = vector.broadcast %33 : vector<1x1xf32> to vector<32x128xf32>
      %35 = arith.cmpf olt, %0, %34 : vector<32x128xf32>
      %36 = arith.ori %31, %35 : vector<32x128xi1>
      %cst_11 = arith.constant 0.000000e+00 : f32
      %37 = vector.broadcast %cst_11 : f32 to vector<32x128xf32>
      %38 = arith.maximumf %0, %37 : vector<32x128xf32>
      %39 = math.absf %0 : vector<32x128xf32>
      %cst_12 = arith.constant 0.000000e+00 : f32
      %40 = vector.broadcast %cst_12 : f32 to vector<32x128xf32>
      %41 = arith.subf %40, %39 : vector<32x128xf32>
      %42 = math.exp %41 : vector<32x128xf32>
      %43 = math.log1p %42 : vector<32x128xf32>
      %44 = arith.addf %38, %43 : vector<32x128xf32>
      %45 = arith.subf %44, %0 : vector<32x128xf32>
      %cst_13 = arith.constant 1.000000e+02 : f32
      %46 = vector.broadcast %cst_13 : f32 to vector<32x128xf32>
      %47 = arith.minimumf %45, %46 : vector<32x128xf32>
      %48 = arith.mulf %1, %47 : vector<32x128xf32>
      %cst_14 = arith.constant 1.000000e+00 : f32
      %49 = vector.broadcast %cst_14 : f32 to vector<32x128xf32>
      %50 = arith.subf %49, %1 : vector<32x128xf32>
      %cst_15 = arith.constant 1.000000e+02 : f32
      %51 = vector.broadcast %cst_15 : f32 to vector<32x128xf32>
      %52 = arith.minimumf %44, %51 : vector<32x128xf32>
      %53 = arith.mulf %50, %52 : vector<32x128xf32>
      %54 = arith.addf %48, %53 : vector<32x128xf32>
      %55 = arith.andi %36, %14 : vector<32x128xi1>
      %c0_16 = arith.constant 0 : index
      %c0_17 = arith.constant 0 : index
      %56 = vector.load %arg9[%c0_16, %c0_17] : memref<8x128xf32, #tpu.memory_space<vmem>>, vector<8x128xf32>
      %cst_18 = arith.constant 0.000000e+00 : f32
      %57 = vector.broadcast %cst_18 : f32 to vector<32x128xf32>
      %58 = arith.select %55, %54, %57 : vector<32x128xi1>, vector<32x128xf32>
      %59 = vector.shape_cast %58 : vector<32x128xf32> to vector<4x8x128xf32>
      %cst_19 = arith.constant dense<0.000000e+00> : vector<8x128xf32>
      %60 = vector.multi_reduction <add>, %59, %cst_19 [0] : vector<4x8x128xf32> to vector<8x128xf32>
      %61 = arith.addf %56, %60 : vector<8x128xf32>
      %c0_20 = arith.constant 0 : index
      %c0_21 = arith.constant 0 : index
      %62 = vector.load %arg9[%c0_20, %c0_21] : memref<8x128xf32, #tpu.memory_space<vmem>>, vector<8x128xf32>
      tpu.vector_store %arg9[%c0_20, %c0_21], %61 {strides = array<i32>} : memref<8x128xf32, #tpu.memory_space<vmem>>, vector<8x128xf32>,
      %c0_22 = arith.constant 0 : index
      %c0_23 = arith.constant 0 : index
      %63 = vector.load %arg10[%c0_22, %c0_23] : memref<8x128xf32, #tpu.memory_space<vmem>>, vector<8x128xf32>
      %64 = arith.extui %55 : vector<32x128xi1> to vector<32x128xi32>
      %65 = arith.sitofp %64 : vector<32x128xi32> to vector<32x128xf32>
      %66 = vector.shape_cast %65 : vector<32x128xf32> to vector<4x8x128xf32>
      %cst_24 = arith.constant dense<0.000000e+00> : vector<8x128xf32>
      %67 = vector.multi_reduction <add>, %66, %cst_24 [0] : vector<4x8x128xf32> to vector<8x128xf32>
      %68 = arith.addf %63, %67 : vector<8x128xf32>
      %c0_25 = arith.constant 0 : index
      %c0_26 = arith.constant 0 : index
      %69 = vector.load %arg10[%c0_25, %c0_26] : memref<8x128xf32, #tpu.memory_space<vmem>>, vector<8x128xf32>
      tpu.vector_store %arg10[%c0_25, %c0_26], %68 {strides = array<i32>} : memref<8x128xf32, #tpu.memory_space<vmem>>, vector<8x128xf32>,
      %c0_i32_27 = arith.constant 0 : i32
      %70 = arith.cmpi eq, %arg1, %c0_i32_27 : i32
      %71 = arith.extui %70 : i1 to i32
      %c0_i32_28 = arith.constant 0 : i32
      %72 = arith.cmpi ne, %71, %c0_i32_28 : i32
      scf.if %72 {
        %c0_29 = arith.constant 0 : index
        %c0_30 = arith.constant 0 : index
        %73 = vector.load %arg9[%c0_29, %c0_30] : memref<8x128xf32, #tpu.memory_space<vmem>>, vector<8x128xf32>
        %74 = vector.shape_cast %73 : vector<8x128xf32> to vector<1x8x128xf32>
        %cst_31 = arith.constant dense<0.000000e+00> : vector<1xf32>
        %75 = vector.multi_reduction <add>, %74, %cst_31 [1, 2] : vector<1x8x128xf32> to vector<1xf32>
        %76 = vector.shape_cast %75 : vector<1xf32> to vector<1x1x1xf32>
        %77 = vector.extract %76[0, 0, 0] : f32 from vector<1x1x1xf32>
        %78 = vector.broadcast %77 : f32 to vector<1x1xf32>
        %c0_32 = arith.constant 0 : index
        %c0_33 = arith.constant 0 : index
        %79 = vector.load %arg10[%c0_32, %c0_33] : memref<8x128xf32, #tpu.memory_space<vmem>>, vector<8x128xf32>
        %80 = vector.shape_cast %79 : vector<8x128xf32> to vector<1x8x128xf32>
        %cst_34 = arith.constant dense<0.000000e+00> : vector<1xf32>
        %81 = vector.multi_reduction <add>, %80, %cst_34 [1, 2] : vector<1x8x128xf32> to vector<1xf32>
        %82 = vector.shape_cast %81 : vector<1xf32> to vector<1x1x1xf32>
        %83 = vector.extract %82[0, 0, 0] : f32 from vector<1x1x1xf32>
        %84 = vector.broadcast %83 : f32 to vector<1x1xf32>
        %85 = arith.divf %78, %84 : vector<1x1xf32>
        %c0_35 = arith.constant 0 : index
        %c0_36 = arith.constant 0 : index
        %86 = vector.load %arg4[%c0_35, %c0_36] : memref<1x1xf32, #tpu.memory_space<vmem>>, vector<1x1xf32>
        tpu.vector_store %arg4[%c0_35, %c0_36], %85 {strides = array<i32>} : memref<1x1xf32, #tpu.memory_space<vmem>>, vector<1x1xf32>,
      } else {
      }
    } else {
    }
    return
  }
  func.func @transform_0(%arg0: i32, %arg1: i32) -> (i32, i32) {
    %c0_i32 = arith.constant 0 : i32
    %c0_i32_0 = arith.constant 0 : i32
    return %arg1, %c0_i32 : i32, i32
  }
  func.func @transform_1(%arg0: i32, %arg1: i32) -> (i32, i32) {
    %c0_i32 = arith.constant 0 : i32
    %c0_i32_0 = arith.constant 0 : i32
    return %arg1, %c0_i32 : i32, i32
  }
  func.func @transform_2(%arg0: i32, %arg1: i32) -> (i32, i32) {
    %c0_i32 = arith.constant 0 : i32
    %c0_i32_0 = arith.constant 0 : i32
    %c0_i32_1 = arith.constant 0 : i32
    return %c0_i32, %c0_i32_0 : i32, i32
  }
}

</mosaic_0001>

<bundles_post_ra>
// kernel: tpu_custom_call.1
= control target key start
LH: loop header
LB: loop body
LE: loop exit
PB: predicated region body
PF: predicated region fallthrough
CT: control target
= control target key end

     0   :  { %7 = vsyncpa [#allocation9], 0  ;;  %s1003_s0 = inlined_call_operand.hbm [shape: f32[16,128], index: 0, kind: input, shape index: {}]   ;;  %s1004_s1 = inlined_call_operand.hbm [shape: f32[16,128], index: 1, kind: input, shape index: {}]   ;;  %s1005_s2 = inlined_call_operand.hbm [shape: f32[1,1], index: 2, kind: output, shape index: {}]  }
   0x1   :  { %8 = vsyncpa [#allocation12], 0 }
   0x2   :  { %9 = vsyncpa [#allocation10], 0  ;;  %s858_s9 = smov 0   ;;  %s860_s10 = smov 0  }
   0x3   :  { %s862_s11 = smov 0  }
   0x4 LB: > { %s874_s12 = sadd.s32 4294967295, %s831_s11   ;;  %s27_s13 = sadd.s32 1, %s827_s10  ;;  %s831_s11 = sphi %s862_s11, %s15_s11   ;;  %s827_s10 = sphi %s860_s10, %s1012_s10   ;;  %s823_s9 = sphi %s858_s9, %s1011_s9  }
   0x5   : > { %p29_p0 = scmp.ge.s32.totalorder %s27_s13, 2  ;;  %p619_p1 = scmp.ge.s32.totalorder %s831_s11, 1 }
   0x6   : > { %p105_p2 = scmp.lt.s32.totalorder %s831_s11, 3 }
   0x7   : > { %s1014_s13 = smov (%p29_p0, %s27_s13), 0 }
   0x8   : > { %p881_p3 = pnand %p619_p1, %p105_p2 }
   0x9   : > { %p620_p4 = scmp.ne.s32.totalorder (!%p881_p3), %s874_s12, 0 }
   0xa   : > { %109 = sbr.rel (%p881_p3) target bundleno = 67 (0x43), region = 12 }
  0x11   : > { %113 = sbr.rel (%p620_p4) target bundleno = 42 (0x2a), region = 16 }
  0x18   : > { %119 = vsyncadd [#allocation9], 256  ;;  %s833_s15 = smov [#allocation8]   ;;  %s727_s19 = scalar_lea.hbm %s1003_s0, 256 }
  0x19   : > { %s124_s16 = sshll.u32 %s833_s15, 4  ;;  %p728_p5 = scmp.ne.s32.totalorder %s1003_s0, %s727_s19  ;;  %s125_s16 = int_to_ptr.vmem [resolvable:$true] %s124_s16 }
  0x1a   : > { %p731_p6 = scmp.lt.u32.totalorder %s727_s19, %s1003_s0 }
  0x1c   : > { %p733_p7 = pnand %p731_p6, %p728_p5 }
  0x1e   : > { %736 = shalt.err (!%p733_p7)
}
  0x1f   : > { %s737_s24 = scalar_lea.vmem %s125_s16, 256  ;;  %s741_s25 = scalar_lea.vmem %s125_s16, 512 }
  0x20   : > { %p738_p8 = scmp.ne.s32.totalorder %s125_s16, %s737_s24  ;;  %p742_p9 = scmp.lt.s32.totalorder %s125_s16, %s125_s16 }
  0x21   : > { %p743_p10 = scmp.lt.s32.totalorder %s741_s25, %s737_s24 }
  0x23   : > { %p744_p11 = por %p743_p10, %p742_p9 }
  0x25   : > { %p745_p12 = pnand %p744_p11, %p738_p8 }
  0x27   : > { %748 = shalt.err (!%p745_p12)
}
  0x28   : > { %s834_s26 = smov 128   ;;  %s835_s27 = smov 8  }
  0x29   : > { %130 = dma.hbm_to_vmem [thread:$0]  %s1003_s0, 256, %s125_s16, [#allocation9], %s834_s26, %s834_s26, %s835_s27  }
  0x2a PF: > { %133 = sbr.rel (%p620_p4) target bundleno = 67 (0x43), region = 20 }
  0x31   : > { %139 = vsyncadd [#allocation12], 256  ;;  %s836_s30 = smov [#allocation11]   ;;  %s749_s6 = scalar_lea.hbm %s1004_s1, 256 }
  0x32   : > { %s144_s3 = sshll.u32 %s836_s30, 4  ;;  %p750_p13 = scmp.ne.s32.totalorder %s1004_s1, %s749_s6  ;;  %s145_s3 = int_to_ptr.vmem [resolvable:$true] %s144_s3 }
  0x33   : > { %p753_p0 = scmp.lt.u32.totalorder %s749_s6, %s1004_s1 }
  0x35   : > { %p755_p1 = pnand %p753_p0, %p750_p13 }
  0x37   : > { %758 = shalt.err (!%p755_p1)
}
  0x38   : > { %s759_s16 = scalar_lea.vmem %s145_s3, 256  ;;  %s763_s18 = scalar_lea.vmem %s145_s3, 512 }
  0x39   : > { %p760_p2 = scmp.ne.s32.totalorder %s145_s3, %s759_s16  ;;  %p764_p4 = scmp.lt.s32.totalorder %s145_s3, %s145_s3 }
  0x3a   : > { %p765_p5 = scmp.lt.s32.totalorder %s763_s18, %s759_s16 }
  0x3c   : > { %p766_p6 = por %p765_p5, %p764_p4 }
  0x3e   : > { %p767_p7 = pnand %p766_p6, %p760_p2 }
  0x40   : > { %770 = shalt.err (!%p767_p7)
}
  0x41   : > { %s837_s19 = smov 128   ;;  %s838_s20 = smov 8  }
  0x42   : > { %150 = dma.hbm_to_vmem [thread:$0]  %s1004_s1, 256, %s145_s3, [#allocation12], %s837_s19, %s837_s19, %s838_s20  }
  0x43 PF: > { %160 = sbr.rel (%p881_p3) target bundleno = 742 (0x2e6), region = 28  ;;  %p662_p8 = scmp.eq.s32.totalorder (!%p881_p3), %s874_s12, 0 }
  0x4a   : > { %810 = dma.done.wait (%p662_p8), [#allocation9], 512  }
  0x4b   : > { %812 = vsyncadd (%p662_p8), [#allocation9], 4294966784 }
  0x4c   : > { %814 = dma.done.wait (%p662_p8), [#allocation12], 512  }
  0x4d   : > { %816 = vsyncadd (%p662_p8), [#allocation12], 4294966784  ;;  %v190_v0 = vlaneseq  ;;  %v922_v3 = vld [vmem:[#allocation8] sm:$0xff]  ;;  %v924_v4 = vld [vmem:[#allocation8 + $0x8] sm:$0xff]  ;;  %p625_p3 = scmp.ne.s32.totalorder %s823_s9, 0 }
  0x4e   : > { %v926_v5 = vld [vmem:[#allocation11] sm:$0xff]  ;;  %v928_v6 = vld [vmem:[#allocation11 + $0x8] sm:$0xff]  ;;  %v626_v8 = vmul.f32 (!%p625_p3), -1.442695, %v922_v3  ;;  %v839_v10 = vmov (!%p625_p3), 0.0   ;;  %vm347_vm6 = vcmask (!%p625_p3), 0  }
  0x4f   : > { %v919_v1 = vshrl.u32 %v190_v0, 7  ;;  %223 = sbr.rel (%p625_p3) target bundleno = 326 (0x146), region = 40  ;;  %vm255_vm3 = vcmp.gt.f32.partialorder (!%p625_p3), %v926_v5, 0.0  ;;  %vm256_vm4 = vcmp.gt.f32.partialorder (!%p625_p3), %v928_v6, 0.0  ;;  %v627_v12 = vmul.f32 (!%p625_p3), -1.442695, %v924_v4 }
  0x50   : > { %v634_v11 = vsel (!%p625_p3), %vm255_vm3, 1.0, %v839_v10  ;;  %700 = vpow2.f32 (!%p625_p3), %v626_v8 }
  0x51   : > { %v192_v2 = vadd.s32 8, %v919_v1  ;;  %702 = vpow2.f32 (!%p625_p3), %v627_v12 }
  0x53   : > { %vm204_vm0 = vcmp.lt.s32.totalorder %v192_v2, 15  ;;  %vm208_vm1 = vcmp.eq.s32.totalorder %v192_v2, 15 }
  0x54   : > { %vm930_vm2 = vmor %vm204_vm0, %vm208_vm1 }
  0x55   : > { %vm940_vm5 = vmand (!%p625_p3), %vm256_vm4, %vm930_vm2 }
  0x56   : > { %v635_v13 = vsel %vm940_vm5, 1.0, %v839_v10 }
  0x57   : > { %v280_v14 = vadd.f32 %v635_v13, %v634_v11 }
  0x59   : > { %305 = vadd.xlane.f32.xlu0 %v280_v14 }
  0x5a   : > { %v701_v15 = vpop.eup %700 }
  0x5b   : > { %v703_v16 = vpop.eup %702  ;;  %v243_v17 = vadd.f32 1.0, %v701_v15 }
  0x5c   : > { %v244_v18 = vadd.f32 1.0, %v703_v16 }
  0x5d   : > { %704 = vrcp.f32 %v243_v17 }
  0x5e   : > { %706 = vrcp.f32 %v244_v18 }
  0x67   : > { %v705_v19 = vpop.eup %704 }
  0x68   : > { %v707_v20 = vpop.eup %706  ;;  %v630_v21 = vadd.f32 -0.5, %v705_v19 }
  0x69   : > { %v631_v22 = vadd.f32 -0.5, %v707_v20 }
  0x6a   : > { %v267_v23 = vsel %vm255_vm3, %v630_v21, 0.0 }
  0x6b   : > { %v268_v24 = vsel %vm940_vm5, %v631_v22, 0.0  ;;  %v292_v25 = vmul.f32 %v267_v23, %v267_v23 }
  0x6c   : > { %v286_v26 = vadd.f32 %v268_v24, %v267_v23  ;;  %v293_v27 = vmul.f32 %v268_v24, %v268_v24 }
  0x6e   : > { %316 = vadd.xlane.f32.xlu0 %v286_v26  ;;  %v296_v28 = vadd.f32 %v293_v27, %v292_v25 }
  0x70   : > { %327 = vadd.xlane.f32.xlu1 %v296_v28 }
  0xe6   : > { %v306_v29 = vpop.xlane.xlu0 %305 }
  0xe7   : > { %v307_v30 = vrot.slane %v306_v29, 4 }
  0xe9   : > { %v308_v31 = vadd.f32 %v307_v30, %v306_v29 }
  0xeb   : > { %v309_v32 = vrot.slane %v308_v31, 2 }
  0xed   : > { %v310_v33 = vadd.f32 %v309_v32, %v308_v31 }
  0xef   : > { %v311_v34 = vrot.slane %v310_v33, 1 }
  0xf1   : > { %v312_v35 = vadd.f32 %v311_v34, %v310_v33 }
  0xf3   : > { %644 = vpush %v312_v35 }
  0xfb   : > { %v317_v36 = vpop.xlane.xlu0 %316 }
  0xfc   : > { %v318_v37 = vrot.slane %v317_v36, 4 }
  0xfd   : > { %v328_v38 = vpop.xlane.xlu1 %327 }
  0xfe   : > { %v319_v39 = vadd.f32 %v318_v37, %v317_v36  ;;  %v329_v40 = vrot.slane %v328_v38, 4 }
 0x100   : > { %v320_v41 = vrot.slane %v319_v39, 2  ;;  %v330_v42 = vadd.f32 %v329_v40, %v328_v38 }
 0x102   : > { %v321_v43 = vadd.f32 %v320_v41, %v319_v39  ;;  %v331_v44 = vrot.slane %v330_v42, 2 }
 0x104   : > { %v332_v45 = vadd.f32 %v331_v44, %v330_v42  ;;  %v322_v46 = vrot.slane %v321_v43, 1 }
 0x106   : > { %v323_v47 = vadd.f32 %v322_v46, %v321_v43  ;;  %v333_v48 = vrot.slane %v332_v45, 1 }
 0x108   : > { %646 = vpush %v323_v47  ;;  %v334_v49 = vadd.f32 %v333_v48, %v332_v45 }
 0x10a   : > { %648 = vpush %v334_v49 }
 0x124   : > { %s645_s14 = spop %644 }
 0x125   : > { %v314_v50 = vstv %s645_s14 }
 0x126   : > { %708 = vrcp.f32 %v314_v50  ;;  %v636_v51 = vadd.f32 -1.0, %v314_v50 }
 0x128   : > { %710 = vrcp.f32 %v636_v51 }
 0x130   : > { %v709_v54 = vpop.eup %708 }
 0x132   : > { %v711_v59 = vpop.eup %710 }
 0x139   : > { %s647_s23 = spop %646 }
 0x13a   : > { %v325_v52 = vstv %s647_s23 }
 0x13b   : > { %v340_v53 = vmul.f32 %v325_v52, %v325_v52  ;;  %s649_s24 = spop %648  ;;  %v338_v55 = vmul.f32 %v709_v54, %v325_v52 }
 0x13c   : > { %v336_v57 = vstv %s649_s24 }
 0x13d   : > { %v341_v56 = vmul.f32 %v709_v54, %v340_v53  ;;  %v339_v60 = vadd.f32 0.5, %v338_v55 }
 0x13f   : > { %v342_v58 = vsub.f32 %v336_v57, %v341_v56 }
 0x141   : > { %v345_v61 = vmul.f32 %v711_v59, %v342_v58 }
 0x143   : > { %v346_v62 = vadd.f32 %v345_v61, %v339_v60 }
 0x145   : > { %348 = vst.msk [vmem:[#allocation5] sm:$0x1] %vm347_vm6, %v346_v62 }
 0x146 PF: > { %p637_p9 = scmp.ne.s32.totalorder %s823_s9, 1 }
 0x147   : > { %v840_v0 = vmov (!%p637_p9), 0   ;;  %v376_v17 = vsub.s32 (!%p637_p9), 0, %v919_v1  ;;  %v408_v23 = vand.u32 (!%p637_p9), 2147483647, %v922_v3  ;;  %v409_v24 = vand.u32 (!%p637_p9), 2147483647, %v924_v4 }
 0x148   : > { %352 = sbr.rel (%p637_p9) target bundleno = 717 (0x2cd), region = 52  ;;  %712 = vset.pattern.permute.xlu0 (!%p637_p9), %v840_v0  ;;  %v404_v44 = vmax.f32 (!%p637_p9), %v922_v3, 0.0  ;;  %v405_v46 = vmax.f32 (!%p637_p9), %v924_v4, 0.0  ;;  %v476_v53 = vsub.f32 (!%p637_p9), 1.0, %v926_v5  ;;  %v477_v56 = vsub.f32 (!%p637_p9), 1.0, %v928_v6 }
 0x149   : > { %v412_v25 = vsub.f32 (!%p637_p9), 0.0, %v408_v23  ;;  %v413_v26 = vsub.f32 (!%p637_p9), 0.0, %v409_v24  ;;  %vm547_vm1 = vcmask (!%p637_p9), 0  }
 0x14b   : > { %v416_v27 = vmul.f32 (!%p637_p9), 1.442695, %v412_v25  ;;  %v418_v28 = vmul.f32 (!%p637_p9), 1.442695, %v413_v26 }
 0x14c   : > { %v359_v63 = vld [vmem:[#allocation5] sm:$0x1] (!%p637_p9) }
 0x14d   : > { %v362_v2 = vsub.f32 (!%p637_p9), 0.0, %v359_v63  ;;  %713 = vlog2.f32 (!%p637_p9), %v359_v63 }
 0x14f   : > { %v363_v8 = vadd.f32 1.0, %v362_v2  ;;  %v366_v9 = vmul.f32 -0.5, %v362_v2  ;;  %v369_v11 = vand.u32 2147483647, %v362_v2 }
 0x151   : > { %715 = vlog2.f32 %v363_v8  ;;  %v367_v10 = vadd.f32 1.0, %v366_v9  ;;  %vm370_vm7 = vcmp.lt.f32.partialorder %v369_v11, 0.0004427343  ;;  %v841_v9 = vmov 0.0  }
 0x152   : > { %717 = vpow2.f32 %v416_v27 }
 0x153   : > { %v368_v13 = vmul.f32 %v367_v10, %v362_v2  ;;  %719 = vpow2.f32 %v418_v28 }
 0x157   : > { %v714_v12 = vpop.eup %713 }
 0x158   : > { %v361_v15 = vmul.f32 0.6931472, %v714_v12 }
 0x15b   : > { %v716_v14 = vpop.eup %715 }
 0x15c   : > { %v365_v16 = vmul.f32 0.6931472, %v716_v14  ;;  %v718_v29 = vpop.eup %717 }
 0x15d   : > { %v720_v30 = vpop.eup %719  ;;  %v424_v1 = vadd.f32 1.0, %v718_v29  ;;  %v427_v32 = vmul.f32 -0.5, %v718_v29  ;;  %v430_v36 = vand.u32 2147483647, %v718_v29 }
 0x15e   : > { %v371_v18 = vsel %vm370_vm7, %v368_v13, %v365_v16  ;;  %v433_v31 = vadd.f32 1.0, %v720_v30  ;;  %v436_v33 = vmul.f32 -0.5, %v720_v30  ;;  %v439_v39 = vand.u32 2147483647, %v720_v30 }
 0x15f   : > { %v372_v19 = vsub.f32 %v361_v15, %v371_v18  ;;  %721 = vlog2.f32 %v424_v1  ;;  %v428_v34 = vadd.f32 1.0, %v427_v32  ;;  %vm431_vm8 = vcmp.lt.f32.partialorder %v430_v36, 0.0004427343 }
 0x160   : > { %723 = vlog2.f32 %v433_v31  ;;  %v437_v37 = vadd.f32 1.0, %v436_v33  ;;  %vm440_vm9 = vcmp.lt.f32.partialorder %v439_v39, 0.0004427343 }
 0x161   : > { %v377_v20 = vrot.slane %v372_v19, %v376_v17  ;;  %v386_v21 = vsub.f32 0.0, %v372_v19  ;;  %v429_v41 = vmul.f32 %v718_v29, %v428_v34 }
 0x162   : > { %v438_v43 = vmul.f32 %v720_v30, %v437_v37 }
 0x163   : > { %379 = vperm.xlu0 %712, %v377_v20   ;;  %v391_v22 = vrot.slane %v386_v21, %v376_v17 }
 0x167   : > { %393 = vperm.xlu0 %712, %v391_v22  }
 0x169   : > { %v722_v35 = vpop.eup %721 }
 0x16a   : > { %v724_v38 = vpop.eup %723  ;;  %v426_v40 = vmul.f32 0.6931472, %v722_v35 }
 0x16b   : > { %v435_v42 = vmul.f32 0.6931472, %v724_v38 }
 0x16c   : > { %v432_v45 = vsel %vm431_vm8, %v429_v41, %v426_v40 }
 0x16d   : > { %v441_v47 = vsel %vm440_vm9, %v438_v43, %v435_v42  ;;  %v460_v48 = vadd.f32 %v432_v45, %v404_v44 }
 0x16e   : > { %v461_v49 = vadd.f32 %v441_v47, %v405_v46 }
 0x16f   : > { %v464_v50 = vsub.f32 %v460_v48, %v922_v3  ;;  %v480_v54 = vmin.f32 %v460_v48, 100.0 }
 0x170   : > { %v465_v51 = vsub.f32 %v461_v49, %v924_v4  ;;  %v481_v57 = vmin.f32 %v461_v49, 100.0 }
 0x171   : > { %v468_v52 = vmin.f32 %v464_v50, 100.0  ;;  %v484_v59 = vmul.f32 %v480_v54, %v476_v53 }
 0x172   : > { %v469_v55 = vmin.f32 %v465_v51, 100.0  ;;  %v485_v62 = vmul.f32 %v481_v57, %v477_v56 }
 0x173   : > { %v472_v58 = vmul.f32 %v468_v52, %v926_v5 }
 0x174   : > { %v473_v61 = vmul.f32 %v469_v55, %v928_v6 }
 0x175   : > { %v488_v63 = vadd.f32 %v484_v59, %v472_v58 }
 0x176   : > { %v489_v2 = vadd.f32 %v485_v62, %v473_v61 }
 0x1e2   : > { %v380_v60 = vpop.permute.xlu0 %379 }
 0x1e3   : > { %vm382_vm10 = vcmp.gt.f32.partialorder %v922_v3, %v380_v60  ;;  %vm383_vm13 = vcmp.gt.f32.partialorder %v924_v4, %v380_v60 }
 0x1e6   : > { %v394_v0 = vpop.permute.xlu0 %393 }
 0x1e7   : > { %vm396_vm11 = vcmp.lt.f32.partialorder %v922_v3, %v394_v0  ;;  %vm397_vm12 = vcmp.lt.f32.partialorder %v924_v4, %v394_v0 }
 0x1e8   : > { %vm400_vm14 = vmor %vm382_vm10, %vm396_vm11 }
 0x1e9   : > { %vm401_vm15 = vmor %vm383_vm13, %vm397_vm12  ;;  %v497_v8 = vsel %vm400_vm14, %v488_v63, 0.0  ;;  %v638_v10 = vsel %vm400_vm14, 1.0, %v841_v9 }
 0x1ea   : > { %vm493_vm0 = vmand %vm401_vm15, %vm930_vm2 }
 0x1eb   : > { %v498_v5 = vsel %vm493_vm0, %v489_v2, 0.0  ;;  %v639_v11 = vsel %vm493_vm0, 1.0, %v841_v9 }
 0x1ec   : > { %v501_v6 = vadd.f32 %v498_v5, %v497_v8  ;;  %v515_v12 = vadd.f32 %v639_v11, %v638_v10 }
 0x1ee   : > { %524 = vadd.xlane.f32.xlu1 %v501_v6 }
 0x1f2   : > { %535 = vadd.xlane.f32.xlu1 %v515_v12 }
 0x27b   : > { %v525_v3 = vpop.xlane.xlu1 %524 }
 0x27c   : > { %v526_v13 = vrot.slane %v525_v3, 4 }
 0x27e   : > { %v527_v14 = vadd.f32 %v526_v13, %v525_v3 }
 0x27f   : > { %v536_v15 = vpop.xlane.xlu1 %535 }
 0x280   : > { %v528_v16 = vrot.slane %v527_v14, 2  ;;  %v537_v4 = vrot.slane %v536_v15, 4 }
 0x282   : > { %v538_v17 = vadd.f32 %v537_v4, %v536_v15  ;;  %v529_v18 = vadd.f32 %v528_v16, %v527_v14 }
 0x284   : > { %v539_v19 = vrot.slane %v538_v17, 2  ;;  %v530_v20 = vrot.slane %v529_v18, 1 }
 0x286   : > { %v540_v7 = vadd.f32 %v539_v19, %v538_v17  ;;  %v531_v21 = vadd.f32 %v530_v20, %v529_v18 }
 0x288   : > { %650 = vpush %v531_v21  ;;  %v541_v22 = vrot.slane %v540_v7, 1 }
 0x28a   : > { %v542_v23 = vadd.f32 %v541_v22, %v540_v7 }
 0x28c   : > { %652 = vpush %v542_v23 }
 0x2b9   : > { %s651_s9 = spop %650 }
 0x2ba   : > { %v533_v26 = vstv %s651_s9 }
 0x2bd   : > { %s653_s25 = spop %652 }
 0x2be   : > { %v544_v24 = vstv %s653_s25 }
 0x2bf   : > { %725 = vrcp.f32 %v544_v24 }
 0x2c9   : > { %v726_v25 = vpop.eup %725 }
 0x2ca   : > { %v546_v27 = vmul.f32 %v726_v25, %v533_v26 }
 0x2cc   : > { %548 = vst.msk [vmem:[#allocation13] sm:$0x1] %vm547_vm1, %v546_v27 }
 0x2cd PF: > { %p664_p10 = scmp.eq.s32.totalorder %s874_s12, 1  ;;  %s842_s26 = smov [#allocation13]  }
 0x2ce   : > { %s556_s27 = sshll.u32 %s842_s26, 4  ;;  %s557_s27 = int_to_ptr.vmem [resolvable:$true] %s556_s27 }
 0x2cf   : > { %s771_s28 = scalar_lea.vmem %s557_s27, 16  ;;  %s777_s29 = scalar_lea.vmem %s557_s27, 32 }
 0x2d0   : > { %p772_p11 = scmp.ne.s32.totalorder %s557_s27, %s771_s28  ;;  %p778_p0 = scmp.lt.s32.totalorder %s557_s27, %s557_s27 }
 0x2d1   : > { %p779_p1 = scmp.lt.s32.totalorder %s777_s29, %s771_s28 }
 0x2d2   : > { %p773_p12 = pnand %p772_p11, %p664_p10 }
 0x2d3   : > { %p780_p2 = por %p779_p1, %p778_p0 }
 0x2d4   : > { %p774_p13 = pneg %p773_p12 }
 0x2d6   : > { %p781_p4 = pnand %p780_p2, %p774_p13 }
 0x2d8   : > { %784 = shalt.err (!%p781_p4)
}
 0x2d9   : > { %s785_s4 = scalar_lea.hbm %s1005_s2, 16 }
 0x2da   : > { %p786_p5 = scmp.ne.s32.totalorder %s1005_s2, %s785_s4  ;;  %p791_p8 = scmp.lt.u32.totalorder %s785_s4, %s1005_s2 }
 0x2dc   : > { %p787_p6 = pnand %p786_p5, %p664_p10 }
 0x2de   : > { %p788_p7 = pneg %p787_p6 }
 0x2e0   : > { %p793_p3 = pnand %p791_p8, %p788_p7 }
 0x2e2   : > { %796 = shalt.err (!%p793_p3)
}
 0x2e3   : > { %659 = dma.vmem_to_hbm [thread:$0]  (%p664_p10), %s557_s27, 16, %s1005_s2, [#allocation10]  }
 0x2e4   : > { %818 = dma.done.wait (%p664_p10), [#allocation10], 16  }
 0x2e5   : > { %820 = vsyncadd (%p664_p10), [#allocation10], 4294967280 }
 0x2e6 PF: > { %s15_s11 = sadd.s32 1, %s831_s11   ;;  %s1011_s9 = smov %s827_s10 }
 0x2e7   : > { %p12_p9 = scmp.ge.s32.totalorder %s15_s11, 4   ;;  %s1012_s10 = smov %s1014_s13 }
 0x2e9   :  { %14 = sbr.rel (!%p12_p9) target bundleno = 4 (0x4), region = 87 }
 0x2f0   :  { %569 = vsyncpa [#allocation9], 1 }
 0x2f1   :  { %571 = vsyncpa [#allocation9 + $0x1], 1 }
 0x2f2   :  { %572 = vsyncpa [#allocation12], 1 }
 0x2f3   :  { %573 = vsyncpa [#allocation10], 1 }
 0x2f4   :  { %575 = vsyncpa [#allocation10 + $0x1], 1 }

</bundles_post_ra>
